<compile_context>
chip_gen: v5e
topology: v5e:2x2
jax: 0.10.0
libtpu: 0.0.40
codegen_flags: <defaults>
</compile_context>

<pallas_src>
import functools

import jax
import jax.numpy as jnp
from jax.experimental import pallas as pl
from jax.experimental.pallas import tpu as pltpu


# ----------------------------------------------------------------------------
# Tile-batch selection for the encoder M axis.
# ----------------------------------------------------------------------------
def _pick_tile_batch(batch, seq_len, target_rows=2048):
    """Largest per-step example count whose blocks are (8,128)-legal.

    Mem-bound regime: big M tiles amortize the ~0.35 us/step grid overhead and
    approach the HBM roofline (256 rows ~63%, 512 ~85%, 1024+ ~86%).
    """
    if batch * seq_len <= target_rows:
        return batch                       # single full tile (blocks = full dims)
    best = batch                           # fallback: always legal
    for d in range(batch - 1, 0, -1):
        if batch % d:
            continue
        if d % 8:                          # (tb, H) out block sublane rule
            continue
        if d * seq_len > target_rows:
            continue
        best = d
        break
    # NOTE(v7x): when splitting, grid length >= 2 lets "parallel" shard the M
    # axis across the two TensorCores; at toy sizes a single tile is used.
    return best


# ----------------------------------------------------------------------------
# Kernel 1 (fused): embedding gather + encoder matmul + gelu + last-8 mean pool
#   ids_ref : (TM, 1)  int32  -- TM = TB * S token ids for this tile
#   tab_ref : (V, H)   bf16   -- resident embedding table
#   w_ref   : (H, H)   bf16   -- resident
#   b_ref   : (1, H)   f32    -- resident
#   o_ref   : (TB, H)  f32    -- pooled representations
# ----------------------------------------------------------------------------
def _encode_kernel(ids_ref, tab_ref, w_ref, b_ref, o_ref, *,
                   tb, seq_len, pool_len, vocab, hidden, normalized):
    tm = tb * seq_len
    ids = ids_ref[...]                                              # (tm, 1)
    vocab_iota = jax.lax.broadcasted_iota(jnp.int32, (tm, vocab), 1)
    # Fused gather: one-hot row selection on the MXU (exact for 0/1 weights).
    one_hot = jnp.where(ids == vocab_iota, 1.0, 0.0).astype(jnp.bfloat16)
    x = jnp.dot(one_hot, tab_ref[...],
                preferred_element_type=jnp.float32).astype(jnp.bfloat16)

    # Encoder: gelu(x @ W + b). bf16 MXU inputs, f32 accumulate + elementwise.
    h = jnp.dot(x, w_ref[...], preferred_element_type=jnp.float32)  # (tm, H)
    h = jax.nn.gelu(h + b_ref[...])

    # Last-`pool_len` mean pooling: reshape + sublane/XLU sum (no extra matmul,
    # no per-step mask generation; seq_len=16 keeps the reshape tile-aligned).
    h3 = h.reshape(tb, seq_len, hidden)
    pooled = jnp.sum(h3[:, seq_len - pool_len:, :], axis=1) * (1.0 / pool_len)

    if normalized:
        # torch.nn.functional.normalize: x / max(||x||, 1e-12); rsqrt -> EUP.
        sq = jnp.sum(pooled * pooled, axis=-1, keepdims=True)
        pooled = pooled * jax.lax.rsqrt(jnp.maximum(sq, 1e-24))

    o_ref[...] = pooled.astype(o_ref.dtype)


def encode_reps(token_ids, table, w, b, *, pool_len=8, normalized=False):
    """token_ids: (B, S) int32 -> pooled reps: (B, H) f32."""
    batch, seq_len = token_ids.shape
    vocab, hidden = table.shape
    pool_len = min(pool_len, seq_len)

    tb = _pick_tile_batch(batch, seq_len)
    tm = tb * seq_len
    grid = (batch // tb,)
    ids = token_ids.reshape(batch * seq_len, 1).astype(jnp.int32)

    # Right-sized VMEM request: resident weights + double-buffered id/out
    # blocks + in-kernel temporaries (one-hot, x, h), 2x margin, 16 MiB floor.
    resident = table.size * 2 + w.size * 2 + b.size * 4
    per_step = 2 * (tm * 4 + tb * hidden * 4)
    temps = tm * vocab * 2 + tm * hidden * 2 + 2 * tm * hidden * 4
    vmem_limit = int(min(48 << 20, max(16 << 20,
                                       2 * (resident + per_step + temps))))

    kern = functools.partial(_encode_kernel, tb=tb, seq_len=seq_len,
                             pool_len=pool_len, vocab=vocab, hidden=hidden,
                             normalized=normalized)
    return pl.pallas_call(
        kern,
        out_shape=jax.ShapeDtypeStruct((batch, hidden), jnp.float32),
        grid_spec=pltpu.PrefetchScalarGridSpec(
            num_scalar_prefetch=0,
            grid=grid,
            in_specs=[
                pl.BlockSpec((tm, 1), lambda i: (i, 0)),           # token ids
                pl.BlockSpec((vocab, hidden), lambda i: (0, 0)),   # resident tab
                pl.BlockSpec((hidden, hidden), lambda i: (0, 0)),  # resident W
                pl.BlockSpec((1, hidden), lambda i: (0, 0)),       # resident b
            ],
            out_specs=pl.BlockSpec((tb, hidden), lambda i: (i, 0)),
        ),
        compiler_params=pltpu.CompilerParams(
            # "parallel" lets Mosaic shard M tiles across the two v7x TCs
            # whenever the grid has >= 2 steps.
            dimension_semantics=("parallel",),
            vmem_limit_bytes=vmem_limit,
        ),
    )(ids, table, w, b)


# ----------------------------------------------------------------------------
# Kernel 2: similarity matmul + temperature + cross-entropy loss
#   q_ref: (Bq, H) f32   p_ref: (Bp_pad, H) f32 (rows >= Bp are zero padding)
#   scores -> lane-dense (Bq, Bp_pad) VMEM store, scalar loss -> SMEM.
# ----------------------------------------------------------------------------
def _score_loss_kernel(q_ref, p_ref, scores_ref, loss_ref, *,
                       bq, bp, inv_temperature):
    q = q_ref[...].astype(jnp.bfloat16)
    p = p_ref[...].astype(jnp.bfloat16)
    # TODO(synk): for thousands of cross-device negatives, feed p pre-transposed
    # as (H, Bp) and tile (Bq, Bp) flash-style to avoid the in-kernel transpose.
    s = jax.lax.dot_general(
        q, p, (((1,), (1,)), ((), ())),
        preferred_element_type=jnp.float32) * inv_temperature      # (Bq, Bp_pad)
    scores_ref[...] = s                     # unmasked, lane-dense store

    group = bp // bq                        # passages per query
    col = jax.lax.broadcasted_iota(jnp.int32, s.shape, 1)
    row = jax.lax.broadcasted_iota(jnp.int32, s.shape, 0)
    # cross entropy with target[i] = i * group, reduction='mean' (f32 LSE);
    # padded columns masked out of the LSE and never selected by `picked`.
    s_valid = jnp.where(col < bp, s, -1e30)
    m = jnp.max(s_valid, axis=1, keepdims=True)                    # (Bq, 1)
    lse = m[:, 0] + jnp.log(jnp.sum(jnp.exp(s_valid - m), axis=1))  # (Bq,)
    picked = jnp.sum(jnp.where(col == row * group, s, 0.0), axis=1)
    loss_ref[0] = jnp.mean(lse - picked)                           # scalar -> SMEM


def scores_and_loss(q_reps, p_reps, temperature=1.0):
    bq, hidden = q_reps.shape
    bp, _ = p_reps.shape
    assert bp % bq == 0, "passage batch must be a multiple of the query batch"
    bp_pad = max(128, ((bp + 127) // 128) * 128)     # lane-dense scores columns
    p_pad = jnp.pad(p_reps, ((0, bp_pad - bp), (0, 0)))

    kern = functools.partial(_score_loss_kernel, bq=bq, bp=bp,
                             inv_temperature=1.0 / float(temperature))
    scores_pad, loss = pl.pallas_call(
        kern,
        out_shape=(
            jax.ShapeDtypeStruct((bq, bp_pad), jnp.float32),
            jax.ShapeDtypeStruct((1,), jnp.float32),
        ),
        in_specs=[
            pl.BlockSpec((bq, hidden), lambda: (0, 0)),
            pl.BlockSpec((bp_pad, hidden), lambda: (0, 0)),
        ],
        out_specs=(
            pl.BlockSpec((bq, bp_pad), lambda: (0, 0)),
            pl.BlockSpec(memory_space=pltpu.MemorySpace.SMEM),
        ),
    )(q_reps, p_pad)
    return scores_pad[:, :bp], loss


# ----------------------------------------------------------------------------
# BiEncoderModel forward (glue in plain JAX)
# ----------------------------------------------------------------------------
class BiEncoderModelPallas:
    def __init__(self, params, normlized=False, temperature=1.0):
        self.params = params
        self.normlized = normlized
        # matches PyTorch __init__: temperature reset to 1.0 if not normalized
        self.temperature = temperature if normlized else 1.0

    def encode(self, input_ids):
        if input_ids is None:
            return None
        return encode_reps(input_ids, self.params["embedding"],
                           self.params["w"], self.params["b"],
                           pool_len=8, normalized=self.normlized)

    def forward(self, query_ids, passage_ids):
        if query_ids is not None and passage_ids is not None \
                and query_ids.shape[1] == passage_ids.shape[1]:
            # Single fused encoder pallas_call for queries + passages: halves
            # dispatch / pipeline warm-up and the resident table/W/b DMAs.
            bq = query_ids.shape[0]
            reps = encode_reps(
                jnp.concatenate([query_ids, passage_ids], axis=0),
                self.params["embedding"], self.params["w"], self.params["b"],
                pool_len=8, normalized=self.normlized)
            q_reps, p_reps = reps[:bq], reps[bq:]
        else:
            q_reps = self.encode(query_ids)
            p_reps = self.encode(passage_ids)
        # TODO(synk): negatives_cross_device all-gather not implemented
        # (single-device path; would be a make_async_remote_copy ring).
        scores, loss = scores_and_loss(q_reps, p_reps, self.temperature)
        return {"loss": loss[0], "scores": scores,
                "q_reps": q_reps, "p_reps": p_reps}


if __name__ == "__main__":
    key = jax.random.PRNGKey(0)
    k_emb, k_w, k_b, k_q, k_p = jax.random.split(key, 5)

    VOCAB, SEQ, HIDDEN = 64, 16, 128
    BQ, BP = 2, 4                                            # 2 passages / query

    # bf16 weights for the MXU hot path; f32 bias (added in f32 inside kernel).
    emb_tab = (jax.random.normal(k_emb, (VOCAB, HIDDEN), jnp.float32)
               * 0.02).astype(jnp.bfloat16)
    w = (jax.random.normal(k_w, (HIDDEN, HIDDEN), jnp.float32)
         * 0.02).astype(jnp.bfloat16)
    b = jax.random.normal(k_b, (1, HIDDEN), jnp.float32) * 0.02

    params = {"embedding": emb_tab, "w": w, "b": b}

    query_ids = jax.random.randint(k_q, (BQ, SEQ), 0, VOCAB, jnp.int32)
    passage_ids = jax.random.randint(k_p, (BP, SEQ), 0, VOCAB, jnp.int32)

    model = BiEncoderModelPallas(params, normlized=False, temperature=1.0)
    out = model.forward(query_ids, passage_ids)
    jax.block_until_ready(out)

    # sanity check against a pure-JAX reference (same bf16-rounded params,
    # computed in f32 end-to-end)
    def ref_forward():
        e_f32 = emb_tab.astype(jnp.float32)
        w_f32 = w.astype(jnp.float32)

        def enc(ids):
            h = jax.nn.gelu(e_f32[ids] @ w_f32 + b)
            return jnp.mean(h[:, -8:, :], axis=1)

        q, p = enc(query_ids), enc(passage_ids)
        s = q @ p.T
        tgt = jnp.arange(q.shape[0]) * (p.shape[0] // q.shape[0])
        lse = jax.nn.logsumexp(s, axis=1)
        loss = jnp.mean(lse - s[jnp.arange(q.shape[0]), tgt])
        return q, p, s, loss

    q_ref, p_ref, s_ref, loss_ref_val = ref_forward()
    assert jnp.allclose(out["q_reps"], q_ref, atol=3e-4, rtol=1e-3)
    assert jnp.allclose(out["p_reps"], p_ref, atol=3e-4, rtol=1e-3)
    assert jnp.allclose(out["scores"], s_ref, atol=3e-4, rtol=1e-3)
    assert jnp.allclose(out["loss"], loss_ref_val, atol=3e-4, rtol=1e-3)

    print("KERNEL_OK")
</pallas_src>

<mosaic_0001>
module attributes {stable_mosaic.version = 11 : i64} {
  func.func @_encode_kernel(%arg0: i32, %arg1: memref<96x1xi32, #tpu.memory_space<vmem>>, %arg2: memref<64x128xbf16, #tpu.memory_space<vmem>>, %arg3: memref<128x128xbf16, #tpu.memory_space<vmem>>, %arg4: memref<1x128xf32, #tpu.memory_space<vmem>>, %arg5: memref<6x128xf32, #tpu.memory_space<vmem>>) attributes {dimension_semantics = [#tpu.dimension_semantics<parallel>], iteration_bounds = array<i64: 1>, scalar_prefetch = 0 : i64, scratch_operands = 0 : i64, tpu.core_type = #tpu.core_type<tc>, window_params = [{transform_indices = @transform_0, window_bounds = array<i64: 96, 1>}, {pipeline_mode = #tpu.pipeline_mode<synchronous>, transform_indices = @transform_1, window_bounds = array<i64: 64, 128>}, {pipeline_mode = #tpu.pipeline_mode<synchronous>, transform_indices = @transform_2, window_bounds = array<i64: 128, 128>}, {pipeline_mode = #tpu.pipeline_mode<synchronous>, transform_indices = @transform_3, window_bounds = array<i64: 1, 128>}, {transform_indices = @transform_4, window_bounds = array<i64: 6, 128>}]} {
    %c0 = arith.constant 0 : index
    %c0_0 = arith.constant 0 : index
    %0 = vector.load %arg1[%c0, %c0_0] : memref<96x1xi32, #tpu.memory_space<vmem>>, vector<96x1xi32>
    %1 = tpu.iota {dimensions = array<i32: 1>} : vector<96x64xi32>
    %2 = vector.broadcast %0 : vector<96x1xi32> to vector<96x64xi32>
    %3 = arith.cmpi eq, %2, %1 : vector<96x64xi32>
    %cst = arith.constant 1.000000e+00 : f32
    %cst_1 = arith.constant 0.000000e+00 : f32
    %4 = vector.broadcast %cst : f32 to vector<96x64xf32>
    %5 = vector.broadcast %cst_1 : f32 to vector<96x64xf32>
    %6 = arith.select %3, %4, %5 : vector<96x64xi1>, vector<96x64xf32>
    %7 = arith.truncf %6 : vector<96x64xf32> to vector<96x64xbf16>
    %c0_2 = arith.constant 0 : index
    %c0_3 = arith.constant 0 : index
    %8 = vector.load %arg2[%c0_2, %c0_3] : memref<64x128xbf16, #tpu.memory_space<vmem>>, vector<64x128xbf16>
    %cst_4 = arith.constant dense<0.000000e+00> : vector<96x128xf32>
    %9 = tpu.matmul %7, %8, %cst_4 {dimension_numbers = #tpu.dot_dimension_numbers<[1], [0], [0], [1], [0, 0, 1, 1], [], []>} : vector<96x64xbf16>, vector<64x128xbf16>, vector<96x128xf32> -> vector<96x128xf32>
    %10 = arith.truncf %9 : vector<96x128xf32> to vector<96x128xbf16>
    %c0_5 = arith.constant 0 : index
    %c0_6 = arith.constant 0 : index
    %11 = vector.load %arg3[%c0_5, %c0_6] : memref<128x128xbf16, #tpu.memory_space<vmem>>, vector<128x128xbf16>
    %cst_7 = arith.constant dense<0.000000e+00> : vector<96x128xf32>
    %12 = tpu.matmul %10, %11, %cst_7 {dimension_numbers = #tpu.dot_dimension_numbers<[1], [0], [0], [1], [0, 0, 1, 1], [], []>} : vector<96x128xbf16>, vector<128x128xbf16>, vector<96x128xf32> -> vector<96x128xf32>
    %c0_8 = arith.constant 0 : index
    %c0_9 = arith.constant 0 : index
    %13 = vector.load %arg4[%c0_8, %c0_9] : memref<1x128xf32, #tpu.memory_space<vmem>>, vector<1x128xf32>
    %14 = vector.broadcast %13 : vector<1x128xf32> to vector<96x128xf32>
    %15 = arith.addf %12, %14 : vector<96x128xf32>
    %16 = arith.mulf %15, %15 : vector<96x128xf32>
    %17 = arith.mulf %15, %16 : vector<96x128xf32>
    %cst_10 = arith.constant 4.471500e-02 : f32
    %18 = vector.broadcast %cst_10 : f32 to vector<96x128xf32>
    %19 = arith.mulf %18, %17 : vector<96x128xf32>
    %20 = arith.addf %15, %19 : vector<96x128xf32>
    %cst_11 = arith.constant 0.797884583 : f32
    %21 = vector.broadcast %cst_11 : f32 to vector<96x128xf32>
    %22 = arith.mulf %21, %20 : vector<96x128xf32>
    %23 = math.tanh %22 : vector<96x128xf32>
    %cst_12 = arith.constant 1.000000e+00 : f32
    %24 = vector.broadcast %cst_12 : f32 to vector<96x128xf32>
    %25 = arith.addf %24, %23 : vector<96x128xf32>
    %cst_13 = arith.constant 5.000000e-01 : f32
    %26 = vector.broadcast %cst_13 : f32 to vector<96x128xf32>
    %27 = arith.mulf %26, %25 : vector<96x128xf32>
    %28 = arith.mulf %15, %27 : vector<96x128xf32>
    %29 = vector.shape_cast %28 : vector<96x128xf32> to vector<6x16x128xf32>
    %30 = vector.extract_strided_slice %29 {offsets = [0, 8, 0], sizes = [6, 8, 128], strides = [1, 1, 1]} : vector<6x16x128xf32> to vector<6x8x128xf32>
    %cst_14 = arith.constant dense<0.000000e+00> : vector<6x128xf32>
    %31 = vector.multi_reduction <add>, %30, %cst_14 [1] : vector<6x8x128xf32> to vector<6x128xf32>
    %cst_15 = arith.constant 1.250000e-01 : f32
    %32 = vector.broadcast %cst_15 : f32 to vector<6x128xf32>
    %33 = arith.mulf %31, %32 : vector<6x128xf32>
    %c0_16 = arith.constant 0 : index
    %c0_17 = arith.constant 0 : index
    %34 = vector.load %arg5[%c0_16, %c0_17] : memref<6x128xf32, #tpu.memory_space<vmem>>, vector<6x128xf32>
    tpu.vector_store %arg5[%c0_16, %c0_17], %33 {strides = array<i32>} : memref<6x128xf32, #tpu.memory_space<vmem>>, vector<6x128xf32>,
    return
  }
  func.func @transform_0(%arg0: i32) -> (i32, i32) {
    %c0_i32 = arith.constant 0 : i32
    %c0_i32_0 = arith.constant 0 : i32
    return %arg0, %c0_i32 : i32, i32
  }
  func.func @transform_1(%arg0: i32) -> (i32, i32) {
    %c0_i32 = arith.constant 0 : i32
    %c0_i32_0 = arith.constant 0 : i32
    %c0_i32_1 = arith.constant 0 : i32
    return %c0_i32, %c0_i32_0 : i32, i32
  }
  func.func @transform_2(%arg0: i32) -> (i32, i32) {
    %c0_i32 = arith.constant 0 : i32
    %c0_i32_0 = arith.constant 0 : i32
    %c0_i32_1 = arith.constant 0 : i32
    return %c0_i32, %c0_i32_0 : i32, i32
  }
  func.func @transform_3(%arg0: i32) -> (i32, i32) {
    %c0_i32 = arith.constant 0 : i32
    %c0_i32_0 = arith.constant 0 : i32
    %c0_i32_1 = arith.constant 0 : i32
    return %c0_i32, %c0_i32_0 : i32, i32
  }
  func.func @transform_4(%arg0: i32) -> (i32, i32) {
    %c0_i32 = arith.constant 0 : i32
    %c0_i32_0 = arith.constant 0 : i32
    return %arg0, %c0_i32 : i32, i32
  }
}

</mosaic_0001>

<bundles_post_ra>
// kernel: tpu_custom_call.1
= control target key start
LH: loop header
LB: loop body
LE: loop exit
PB: predicated region body
PF: predicated region fallthrough
CT: control target
= control target key end

     0   :  { %v549_v2 = vmov 0   ;;  %s672_s0 = inlined_call_operand.vmem [shape: s32[96,1], index: 0, kind: input, shape index: {}]   ;;  %s673_s1 = inlined_call_operand.vmem [shape: bf16[64,128], index: 1, kind: input, shape index: {}]   ;;  %s674_s2 = inlined_call_operand.vmem [shape: bf16[128,128], index: 2, kind: input, shape index: {}]   ;;  %s675_s3 = inlined_call_operand.vmem [shape: f32[1,128], index: 3, kind: input, shape index: {}]   ;;  %s676_s4 = inlined_call_operand.hbm [shape: f32[6,128], index: 4, kind: output, shape index: {}]  }
   0x1   :  { %v21_v0 = vld [vmem:[%s672_s0 + $0x10] sm:$0xff]  ;;  %v19_v1 = vld [vmem:[%s672_s0] sm:$0xff]  ;;  %508 = vset.pattern.permute.xlu1 %v549_v2  ;;  %507 = vset.pattern.permute.xlu0 %v549_v2  ;;  %v483_v4 = vld [vmem:[%s673_s1 + $0x18] sm:$0xff] }
   0x2   :  { %40 = vperm.xlu1 %508, %v21_v0   ;;  %34 = vperm.xlu0 %507, %v19_v1   ;;  %v23_v3 = vld [vmem:[%s672_s0 + $0x20] sm:$0xff] }
   0x3   :  { %509 = vset.pattern.permute.xlu2 %v549_v2 }
   0x4   :  { %46 = vperm.xlu2 %509, %v23_v3  }
   0x5   :  { %9 = vsyncpa [#allocation3], 0  ;;  %154 = vmatpush.bf16.msra.mxu0 %v483_v4  ;;  %492 = vmatpush.bf16.msra.mxu3 %v483_v4  ;;  %v22_v5 = vld [vmem:[%s672_s0 + $0x18] sm:$0xff]  ;;  %v20_v6 = vld [vmem:[%s672_s0 + $0x8] sm:$0xff]  ;;  %v31_v17 = vlaneseq  ;;  %v550_v23 = vmov 0.0   ;;  %vm131_vm2 = vcmask 523264  }
   0x6   :  { %v24_v7 = vld [vmem:[%s672_s0 + $0x28] sm:$0xff]  ;;  %v26_v8 = vld [vmem:[%s672_s0 + $0x38] sm:$0xff]  ;;  %v25_v9 = vld [vmem:[%s672_s0 + $0x30] sm:$0xff]  ;;  %vm398_vm13 = vcmask 1041409   ;;  %vm400_vm14 = vcmask 1042434   ;;  %vm402_vm15 = vcmask 1043459  }
   0x7   :  { %v27_v10 = vld [vmem:[%s672_s0 + $0x40] sm:$0xff]  ;;  %v29_v11 = vld [vmem:[%s672_s0 + $0x50] sm:$0xff]  ;;  %v28_v12 = vld [vmem:[%s672_s0 + $0x48] sm:$0xff]  ;;  %v32_v20 = vand.u32 127, %v31_v17  ;;  %s417_s13 = sshll.u32 %s676_s4, 4  ;;  %s418_s13 = int_to_ptr.hbm [resolvable:$true] %s417_s13 }
   0x8   :  { %v30_v13 = vld [vmem:[%s672_s0 + $0x58] sm:$0xff]  ;;  %v482_v14 = vld [vmem:[%s673_s1 + $0x10] sm:$0xff]  ;;  %v481_v15 = vld [vmem:[%s673_s1 + $0x8] sm:$0xff] }
   0x9   :  { %155 = vmatpush.bf16.msra.mxu0 %v482_v14  ;;  %493 = vmatpush.bf16.msra.mxu3 %v482_v14  ;;  %v480_v16 = vld [vmem:[%s673_s1] sm:$0xff]  ;;  %v491_v39 = vld [vmem:[%s674_s2 + $0x38] sm:$0xff]  ;;  %v490_v40 = vld [vmem:[%s674_s2 + $0x30] sm:$0xff] }
   0xa   :  { %43 = vperm.xlu1 %508, %v22_v5   ;;  %37 = vperm.xlu0 %507, %v20_v6   ;;  %v489_v43 = vld [vmem:[%s674_s2 + $0x28] sm:$0xff]  ;;  %v488_v44 = vld [vmem:[%s674_s2 + $0x20] sm:$0xff]  ;;  %v487_v51 = vld [vmem:[%s674_s2 + $0x18] sm:$0xff] }
   0xb   :  { %263 = vmatpush.bf16.msra.mxu1 %v491_v39  ;;  %496 = vmatpush.bf16.msra.mxu2 %v491_v39  ;;  %v486_v55 = vld [vmem:[%s674_s2 + $0x10] sm:$0xff]  ;;  %v485_v56 = vld [vmem:[%s674_s2 + $0x8] sm:$0xff]  ;;  %v484_v57 = vld [vmem:[%s674_s2] sm:$0xff] }
   0xc   :  { %49 = vperm.xlu2 %509, %v24_v7  }
   0xd   :  { %156 = vmatpush.bf16.msra.mxu0 %v481_v15  ;;  %494 = vmatpush.bf16.msra.mxu3 %v481_v15 }
   0xf   :  { %264 = vmatpush.bf16.msra.mxu1 %v490_v40  ;;  %497 = vmatpush.bf16.msra.mxu2 %v490_v40 }
  0x11   :  { %157 = vmatpush.bf16.msra.mxu0 %v480_v16  ;;  %495 = vmatpush.bf16.msra.mxu3 %v480_v16 }
  0x12   :  { %55 = vperm.xlu1 %508, %v26_v8   ;;  %52 = vperm.xlu0 %507, %v25_v9  }
  0x13   :  { %265 = vmatpush.bf16.msra.mxu1 %v489_v43  ;;  %498 = vmatpush.bf16.msra.mxu2 %v489_v43 }
  0x14   :  { %58 = vperm.xlu2 %509, %v27_v10  }
  0x17   :  { %266 = vmatpush.bf16.msra.mxu1 %v488_v44  ;;  %499 = vmatpush.bf16.msra.mxu2 %v488_v44 }
  0x1a   :  { %64 = vperm.xlu1 %508, %v29_v11   ;;  %61 = vperm.xlu0 %507, %v28_v12  }
  0x1b   :  { %267 = vmatpush.bf16.msra.mxu1 %v487_v51  ;;  %500 = vmatpush.bf16.msra.mxu2 %v487_v51 }
  0x1c   :  { %67 = vperm.xlu2 %509, %v30_v13   ;;  %v658_v13 = vld [vmem:[%s675_s3] ss:$0 sm:$0xff]  ;;  %s551_s3 = smov [#allocation2]  }
  0x1d   :  { %s415_s10 = sshll.u32 %s551_s3, 4  ;;  %s416_s10 = int_to_ptr.vmem [resolvable:$true] %s415_s10 }
  0x1f   :  { %268 = vmatpush.bf16.msra.mxu1 %v486_v55  ;;  %501 = vmatpush.bf16.msra.mxu2 %v486_v55 }
  0x23   :  { %269 = vmatpush.bf16.msra.mxu1 %v485_v56  ;;  %502 = vmatpush.bf16.msra.mxu2 %v485_v56 }
  0x27   :  { %270 = vmatpush.bf16.msra.mxu1 %v484_v57  ;;  %503 = vmatpush.bf16.msra.mxu2 %v484_v57 }
  0x5e   :  { %v47_v18 = vpop.permute.xlu2 %46 }
  0x5f   :  { %vm73_vm7 = vcmp.eq.s32.totalorder %v47_v18, %v32_v20 }
  0x60   :  { %v85_v45 = vsel %vm73_vm7, 1.0, %v550_v23 }
  0x66   :  { %v50_v25 = vpop.permute.xlu2 %49 }
  0x67   :  { %vm74_vm8 = vcmp.eq.s32.totalorder %v50_v25, %v32_v20 }
  0x68   :  { %v86_v46 = vsel %vm74_vm8, 1.0, %v550_v23 }
  0x69   :  { %v95_v49 = vpack.c.bf16 %v86_v46, %v85_v45 }
  0x6e   :  { %v59_v30 = vpop.permute.xlu2 %58 }
  0x6f   :  { %vm77_vm5 = vcmp.eq.s32.totalorder %v59_v30, %v32_v20 }
  0x70   :  { %v89_v33 = vsel %vm77_vm5, 1.0, %v550_v23 }
  0x74   :  { %v35_v19 = vpop.permute.xlu0 %34  ;;  %v41_v21 = vpop.permute.xlu1 %40 }
  0x75   :  { %vm69_vm0 = vcmp.eq.s32.totalorder %v35_v19, %v32_v20  ;;  %vm71_vm3 = vcmp.eq.s32.totalorder %v41_v21, %v32_v20 }
  0x76   :  { %v81_v24 = vsel %vm69_vm0, 1.0, %v550_v23  ;;  %v83_v31 = vsel %vm71_vm3, 1.0, %v550_v23  ;;  %v68_v41 = vpop.permute.xlu2 %67  ;;  %vm404_vm0 = vcmask 1044484  }
  0x77   :  { %vm80_vm9 = vcmp.eq.s32.totalorder %v68_v41, %v32_v20 }
  0x78   :  { %v92_v47 = vsel %vm80_vm9, 1.0, %v550_v23 }
  0x7c   :  { %v38_v22 = vpop.permute.xlu0 %37  ;;  %v44_v28 = vpop.permute.xlu1 %43 }
  0x7d   :  { %vm70_vm1 = vcmp.eq.s32.totalorder %v38_v22, %v32_v20  ;;  %vm72_vm4 = vcmp.eq.s32.totalorder %v44_v28, %v32_v20 }
  0x7e   :  { %v82_v26 = vsel %vm70_vm1, 1.0, %v550_v23  ;;  %v84_v32 = vsel %vm72_vm4, 1.0, %v550_v23  ;;  %vm406_vm1 = vcmask 1045509  }
  0x7f   :  { %v93_v27 = vpack.c.bf16 %v82_v26, %v81_v24  ;;  %v94_v37 = vpack.c.bf16 %v84_v32, %v83_v31 }
  0x81   :  { %442 = vmatmul.msk.bf16.vlgmr.msra.gmra.mxu0 %vm131_vm2, %v93_v27 }
  0x84   :  { %v53_v29 = vpop.permute.xlu0 %52  ;;  %v56_v34 = vpop.permute.xlu1 %55 }
  0x85   :  { %vm76_vm11 = vcmp.eq.s32.totalorder %v56_v34, %v32_v20  ;;  %vm75_vm12 = vcmp.eq.s32.totalorder %v53_v29, %v32_v20 }
  0x86   :  { %v88_v52 = vsel %vm76_vm11, 1.0, %v550_v23  ;;  %v87_v53 = vsel %vm75_vm12, 1.0, %v550_v23 }
  0x87   :  { %v96_v54 = vpack.c.bf16 %v88_v52, %v87_v53 }
  0x8c   :  { %v62_v35 = vpop.permute.xlu0 %61  ;;  %v65_v42 = vpop.permute.xlu1 %64 }
  0x8d   :  { %vm78_vm6 = vcmp.eq.s32.totalorder %v62_v35, %v32_v20  ;;  %vm79_vm10 = vcmp.eq.s32.totalorder %v65_v42, %v32_v20 }
  0x8e   :  { %v90_v36 = vsel %vm78_vm6, 1.0, %v550_v23  ;;  %v91_v48 = vsel %vm79_vm10, 1.0, %v550_v23 }
  0x8f   :  { %v97_v38 = vpack.c.bf16 %v90_v36, %v89_v33  ;;  %v98_v50 = vpack.c.bf16 %v92_v47, %v91_v48 }
  0x91   :  { %443 = vmatmul.msk.bf16.gmra.mxu0 %vm131_vm2, %v94_v37  ;;  %446 = vmatmul.msk.bf16.vlgmr.msra.gmra.mxu3 %vm131_vm2, %v97_v38 }
  0xa1   :  { %444 = vmatmul.msk.bf16.gmra.mxu0 %vm131_vm2, %v95_v49  ;;  %447 = vmatmul.msk.bf16.gmra.mxu3 %vm131_vm2, %v98_v50 }
  0xb1   :  { %445 = vmatmul.msk.bf16.gmra.mxu0 %vm131_vm2, %v96_v54 }
  0xfe   :  { %v159_v58 = vpop.f32.mrf.mxu0 }
 0x106   :  { %v161_v59 = vpop.f32.mrf.mxu0 }
 0x107   :  { %v189_v60 = vpack.c.bf16 %v161_v59, %v159_v58 }
 0x109   :  { %271 = vmatmul.bf16.vlgmr.msra.gmra.mxu1 %v189_v60 }
 0x10e   :  { %v164_v61 = vpop.f32.mrf.mxu0 }
 0x114   :  { %v179_v4 = vpop.f32.mrf.mxu3 }
 0x116   :  { %v166_v62 = vpop.f32.mrf.mxu0 }
 0x117   :  { %v190_v63 = vpack.c.bf16 %v166_v62, %v164_v61 }
 0x119   :  { %275 = vmatmul.bf16.gmra.mxu1 %v190_v63 }
 0x11c   :  { %v181_v7 = vpop.f32.mrf.mxu3 }
 0x11d   :  { %v193_v8 = vpack.c.bf16 %v181_v7, %v179_v4 }
 0x11e   :  { %v169_v0 = vpop.f32.mrf.mxu0 }
 0x124   :  { %v184_v9 = vpop.f32.mrf.mxu3 }
 0x126   :  { %v171_v1 = vpop.f32.mrf.mxu0 }
 0x127   :  { %v191_v2 = vpack.c.bf16 %v171_v1, %v169_v0 }
 0x129   :  { %279 = vmatmul.bf16.gmra.mxu1 %v191_v2 }
 0x12c   :  { %v186_v10 = vpop.f32.mrf.mxu3 }
 0x12d   :  { %v194_v11 = vpack.c.bf16 %v186_v10, %v184_v9 }
 0x12e   :  { %v174_v3 = vpop.f32.mrf.mxu0 }
 0x136   :  { %v176_v5 = vpop.f32.mrf.mxu0 }
 0x137   :  { %v192_v6 = vpack.c.bf16 %v176_v5, %v174_v3 }
 0x139   :  { %283 = vmatmul.bf16.vlgmr.msra.gmra.mxu2 %v192_v6 }
 0x149   :  { %287 = vmatmul.bf16.gmra.mxu2 %v193_v8 }
 0x159   :  { %291 = vmatmul.bf16.gmra.mxu2 %v194_v11 }
 0x186   :  { %v272_v12 = vpop.f32.mrf.mxu1 }
 0x18e   :  { %v273_v14 = vpop.f32.mrf.mxu1 }
 0x18f   :  { %v274_v15 = vadd.f32 %v658_v13, %v273_v14 }
 0x191   :  { %v296_v16 = vmul.f32 %v274_v15, %v274_v15 }
 0x193   :  { %v302_v17 = vmul.f32 %v296_v16, %v274_v15 }
 0x195   :  { %v308_v18 = vmul.f32 0.044715, %v302_v17 }
 0x196   :  { %v276_v19 = vpop.f32.mrf.mxu1 }
 0x197   :  { %v314_v20 = vadd.f32 %v308_v18, %v274_v15 }
 0x199   :  { %v320_v21 = vmul.f32 0.7978846, %v314_v20 }
 0x19b   :  { %511 = vtanh.f32 %v320_v21 }
 0x19e   :  { %v277_v22 = vpop.f32.mrf.mxu1 }
 0x19f   :  { %v278_v23 = vadd.f32 %v658_v13, %v277_v22 }
 0x1a1   :  { %v512_v24 = vpop.eup %511  ;;  %v297_v25 = vmul.f32 %v278_v23, %v278_v23 }
 0x1a2   :  { %v332_v26 = vadd.f32 1.0, %v512_v24 }
 0x1a3   :  { %v303_v27 = vmul.f32 %v297_v25, %v278_v23 }
 0x1a4   :  { %v338_v28 = vmul.f32 0.5, %v332_v26 }
 0x1a5   :  { %v309_v29 = vmul.f32 0.044715, %v303_v27 }
 0x1a6   :  { %v280_v30 = vpop.f32.mrf.mxu1  ;;  %v344_v32 = vmul.f32 %v338_v28, %v274_v15 }
 0x1a7   :  { %v315_v31 = vadd.f32 %v309_v29, %v278_v23 }
 0x1a8   :  { %v350_v34 = vrot.slane %v344_v32, 4 }
 0x1a9   :  { %v321_v33 = vmul.f32 0.7978846, %v315_v31 }
 0x1aa   :  { %v351_v35 = vadd.f32 %v350_v34, %v344_v32 }
 0x1ab   :  { %513 = vtanh.f32 %v321_v33 }
 0x1ac   :  { %v352_v38 = vrot.slane %v351_v35, 2 }
 0x1ae   :  { %v353_v41 = vadd.f32 %v352_v38, %v351_v35  ;;  %v281_v47 = vpop.f32.mrf.mxu1 }
 0x1af   :  { %v282_v51 = vadd.f32 %v658_v13, %v281_v47 }
 0x1b0   :  { %v354_v44 = vrot.slane %v353_v41, 1 }
 0x1b1   :  { %v514_v36 = vpop.eup %513  ;;  %v298_v55 = vmul.f32 %v282_v51, %v282_v51 }
 0x1b2   :  { %v333_v37 = vadd.f32 1.0, %v514_v36  ;;  %v355_v49 = vadd.f32 %v354_v44, %v353_v41 }
 0x1b3   :  { %v304_v60 = vmul.f32 %v298_v55, %v282_v51 }
 0x1b4   :  { %v339_v39 = vmul.f32 0.5, %v333_v37  ;;  %v386_v53 = vmul.f32 0.125, %v355_v49 }
 0x1b5   :  { %v310_v62 = vmul.f32 0.044715, %v304_v60 }
 0x1b6   :  { %v345_v40 = vmul.f32 %v339_v39, %v278_v23 }
 0x1b7   :  { %v316_v1 = vadd.f32 %v310_v62, %v282_v51 }
 0x1b8   :  { %v356_v42 = vrot.slane %v345_v40, 4 }
 0x1b9   :  { %v322_v3 = vmul.f32 0.7978846, %v316_v1 }
 0x1ba   :  { %v357_v43 = vadd.f32 %v356_v42, %v345_v40 }
 0x1bb   :  { %515 = vtanh.f32 %v322_v3 }
 0x1bc   :  { %v358_v45 = vrot.slane %v357_v43, 2  ;;  %v284_v46 = vpop.f32.mrf.mxu2 }
 0x1be   :  { %v359_v48 = vadd.f32 %v358_v45, %v357_v43 }
 0x1c0   :  { %v360_v50 = vrot.slane %v359_v48, 1 }
 0x1c1   :  { %v516_v12 = vpop.eup %515 }
 0x1c2   :  { %v361_v52 = vadd.f32 %v360_v50, %v359_v48  ;;  %v334_v16 = vadd.f32 1.0, %v516_v12 }
 0x1c4   :  { %v387_v54 = vmul.f32 0.125, %v361_v52  ;;  %v285_v56 = vpop.f32.mrf.mxu2  ;;  %v340_v19 = vmul.f32 0.5, %v334_v16 }
 0x1c5   :  { %v286_v57 = vadd.f32 %v658_v13, %v285_v56 }
 0x1c6   :  { %v664_v58 = vsel %vm398_vm13, %v387_v54, %v386_v53  ;;  %v346_v25 = vmul.f32 %v340_v19, %v282_v51 }
 0x1c7   :  { %v299_v59 = vmul.f32 %v286_v57, %v286_v57 }
 0x1c8   :  { %v362_v31 = vrot.slane %v346_v25, 4 }
 0x1c9   :  { %v305_v61 = vmul.f32 %v299_v59, %v286_v57 }
 0x1ca   :  { %v363_v36 = vadd.f32 %v362_v31, %v346_v25 }
 0x1cb   :  { %v311_v0 = vmul.f32 0.044715, %v305_v61 }
 0x1cc   :  { %v288_v63 = vpop.f32.mrf.mxu2 }
 0x1cd   :  { %v317_v2 = vadd.f32 %v311_v0, %v286_v57 }
 0x1cf   :  { %v323_v5 = vmul.f32 0.7978846, %v317_v2 }
 0x1d1   :  { %517 = vtanh.f32 %v323_v5 }
 0x1d4   :  { %v289_v4 = vpop.f32.mrf.mxu2 }
 0x1d5   :  { %v290_v6 = vadd.f32 %v658_v13, %v289_v4 }
 0x1d7   :  { %v300_v7 = vmul.f32 %v290_v6, %v290_v6  ;;  %v518_v14 = vpop.eup %517 }
 0x1d8   :  { %v335_v17 = vadd.f32 1.0, %v518_v14 }
 0x1d9   :  { %v306_v8 = vmul.f32 %v300_v7, %v290_v6 }
 0x1da   :  { %v341_v21 = vmul.f32 0.5, %v335_v17 }
 0x1db   :  { %v312_v9 = vmul.f32 0.044715, %v306_v8 }
 0x1dc   :  { %v292_v10 = vpop.f32.mrf.mxu2  ;;  %v347_v27 = vmul.f32 %v341_v21, %v286_v57 }
 0x1dd   :  { %v318_v11 = vadd.f32 %v312_v9, %v290_v6 }
 0x1de   :  { %v368_v33 = vrot.slane %v347_v27, 4 }
 0x1df   :  { %v324_v15 = vmul.f32 0.7978846, %v318_v11 }
 0x1e0   :  { %v369_v37 = vadd.f32 %v368_v33, %v347_v27 }
 0x1e1   :  { %519 = vtanh.f32 %v324_v15 }
 0x1e2   :  { %v370_v39 = vrot.slane %v369_v37, 2 }
 0x1e4   :  { %v293_v18 = vpop.f32.mrf.mxu2  ;;  %v371_v44 = vadd.f32 %v370_v39, %v369_v37 }
 0x1e5   :  { %v294_v20 = vadd.f32 %v658_v13, %v293_v18  ;;  %v364_v13 = vrot.slane %v363_v36, 2 }
 0x1e6   :  { %v372_v49 = vrot.slane %v371_v44, 1 }
 0x1e7   :  { %v520_v22 = vpop.eup %519  ;;  %v301_v23 = vmul.f32 %v294_v20, %v294_v20  ;;  %v365_v43 = vadd.f32 %v364_v13, %v363_v36 }
 0x1e8   :  { %v336_v24 = vadd.f32 1.0, %v520_v22  ;;  %v373_v55 = vadd.f32 %v372_v49, %v371_v44 }
 0x1e9   :  { %v307_v26 = vmul.f32 %v301_v23, %v294_v20  ;;  %v366_v48 = vrot.slane %v365_v43, 1 }
 0x1ea   :  { %v342_v28 = vmul.f32 0.5, %v336_v24  ;;  %v389_v61 = vmul.f32 0.125, %v373_v55 }
 0x1eb   :  { %v313_v29 = vmul.f32 0.044715, %v307_v26  ;;  %v367_v53 = vadd.f32 %v366_v48, %v365_v43 }
 0x1ec   :  { %v348_v30 = vmul.f32 %v342_v28, %v290_v6 }
 0x1ed   :  { %v319_v32 = vadd.f32 %v313_v29, %v294_v20  ;;  %v388_v59 = vmul.f32 0.125, %v367_v53 }
 0x1ee   :  { %v374_v34 = vrot.slane %v348_v30, 4 }
 0x1ef   :  { %v325_v35 = vmul.f32 0.7978846, %v319_v32  ;;  %v401_v0 = vsel %vm400_vm14, %v388_v59, %v664_v58 }
 0x1f0   :  { %v375_v38 = vadd.f32 %v374_v34, %v348_v30  ;;  %v403_v2 = vsel %vm402_vm15, %v389_v61, %v401_v0 }
 0x1f1   :  { %521 = vtanh.f32 %v325_v35 }
 0x1f2   :  { %v376_v41 = vrot.slane %v375_v38, 2 }
 0x1f4   :  { %v377_v46 = vadd.f32 %v376_v41, %v375_v38 }
 0x1f6   :  { %v378_v51 = vrot.slane %v377_v46, 1 }
 0x1f7   :  { %v522_v40 = vpop.eup %521 }
 0x1f8   :  { %v337_v42 = vadd.f32 1.0, %v522_v40  ;;  %v379_v56 = vadd.f32 %v378_v51, %v377_v46 }
 0x1fa   :  { %v343_v45 = vmul.f32 0.5, %v337_v42  ;;  %v390_v62 = vmul.f32 0.125, %v379_v56 }
 0x1fc   :  { %v349_v47 = vmul.f32 %v343_v45, %v294_v20  ;;  %v405_v3 = vsel %vm404_vm0, %v390_v62, %v403_v2 }
 0x1fe   :  { %v380_v50 = vrot.slane %v349_v47, 4 }
 0x200   :  { %v381_v52 = vadd.f32 %v380_v50, %v349_v47 }
 0x202   :  { %v382_v54 = vrot.slane %v381_v52, 2 }
 0x204   :  { %v383_v57 = vadd.f32 %v382_v54, %v381_v52 }
 0x206   :  { %v384_v60 = vrot.slane %v383_v57, 1 }
 0x208   :  { %v385_v63 = vadd.f32 %v384_v60, %v383_v57 }
 0x20a   :  { %v391_v1 = vmul.f32 0.125, %v385_v63 }
 0x20c   :  { %v407_v4 = vsel %vm406_vm1, %v391_v1, %v405_v3 }
 0x20d   :  { %409 = vst [vmem:[#allocation2] sm:$0x3f] %v407_v4 }
 0x20e   :  { %420 = dma.vmem_to_hbm [thread:$0]  %s416_s10, 128, %s418_s13, [#allocation3]  }
 0x20f   :  { %547 = dma.done.wait [#allocation3], 128  }
 0x210   :  { %548 = vsyncadd [#allocation3], 4294967168 }
 0x211   :  { %425 = vsyncpa [#allocation3], 1 }

</bundles_post_ra>
